<compile_context>
chip_gen: v7x
topology: tpu7x:2x2x1
jax: 0.10.0
libtpu: 0.0.40
codegen_flags: <defaults>
</compile_context>

<pallas_src>
import functools

import jax
import jax.numpy as jnp
from jax import lax
from jax.experimental import pallas as pl
from jax.experimental.pallas import tpu as pltpu

NUM_CLASSES = 19  # hard-coded in the PyTorch module (F.one_hot(..., num_classes=19))


def _round_up(x, m):
    return (x + m - 1) // m * m


def _combined_loss_kernel(
    x_ref, t_ref,                       # inputs : (1, C, T) logits, (1, 1, T) labels
    inter_ref, union_ref, focal_ref,    # outputs: (1, 1, C, 1), (1, 1, C, 1), (1, 1, 1, 1)
    *, gamma, hw, tile, nt, nt_half, needs_mask,
):
    c = pl.program_id(1)   # core-split index ("parallel")
    s = pl.program_id(2)   # spatial tile within this core's range ("arbitrary", last)

    # Output blocks are indexed only by (b, c): VMEM-resident across s -> accumulate
    # directly into them (no scratch, no final copy).
    @pl.when(s == 0)
    def _():
        inter_ref[...] = jnp.zeros_like(inter_ref)
        union_ref[...] = jnp.zeros_like(union_ref)
        focal_ref[...] = jnp.zeros_like(focal_ref)

    x = x_ref[0].astype(jnp.float32)     # (C, T) logits (bf16 inputs upcast here)
    t = t_ref[0]                         # (1, T) int32 labels
    C, T = x.shape

    # ---- shared softmax pieces (one pass feeds both losses) ----------------------
    m = jnp.max(x, axis=0, keepdims=True)              # (1, T)
    e = jnp.exp(x - m)                                  # (C, T)
    denom = jnp.sum(e, axis=0, keepdims=True)           # (1, T)
    inv = pl.reciprocal(denom, approx=True)              # EUP slot
    inv = inv * (2.0 - denom * inv)                      # one Newton step -> ~exact
    p = e * inv                                          # (C, T) softmax probabilities

    # label-hit mask (no explicit one-hot materialization)
    class_ids = lax.broadcasted_iota(jnp.int32, (C, T), 0)
    hit = class_ids == t                                 # (C, T) bool

    if needs_mask:
        # Global column id of each lane in this block; mask (a) the ragged tail
        # (col >= HW reads uninitialized lanes) and (b) columns owned by the other
        # core when nt is odd (core 1's range starts at nt_half*tile).
        g = c * (nt - nt_half) + s                       # global spatial block index
        col = g * tile + lax.broadcasted_iota(jnp.int32, (1, T), 1)
        lo = c * (nt_half * tile)
        hi = jnp.where(c == 0, jnp.int32(min(nt_half * tile, hw)), jnp.int32(hw))
        valid = (col >= lo) & (col < hi)                 # (1, T) bool
        hit = hit & valid
        p_sp = jnp.where(valid, p, 0.0)                  # select (NOT multiply): garbage
    else:                                                # lanes may hold NaN/Inf
        valid = None
        p_sp = p

    hp = jnp.where(hit, p, 0.0)                          # (C, T), reused twice
    hit_f = hit.astype(jnp.float32)

    # ---- dice partial sums (per class) -------------------------------------------
    inter_part = jnp.sum(hp, axis=1, keepdims=True)                 # (C, 1)
    union_part = jnp.sum(p_sp + hit_f, axis=1, keepdims=True)        # (C, 1)  psum+tcnt fused

    # ---- focal partial sum ---------------------------------------------------------
    pt = jnp.sum(hp, axis=0, keepdims=True)                          # (1, T) target prob
    ce = -jnp.log(jnp.maximum(pt, jnp.finfo(jnp.float32).tiny))      # clamp: exp underflow
    one_m = 1.0 - pt
    if gamma == 2.0:
        mod = one_m * one_m
    elif gamma == 1.0:
        mod = one_m
    else:
        mod = jnp.power(jnp.maximum(one_m, 0.0), gamma)
    focal_px = mod * ce
    if valid is not None:
        focal_px = jnp.where(valid, focal_px, 0.0)
    focal_part = jnp.sum(focal_px, axis=1, keepdims=True)            # (1, 1)

    # ---- accumulate across spatial tiles -------------------------------------------
    inter_ref[...] += inter_part[None, None]
    union_ref[...] += union_part[None, None]
    focal_ref[...] += focal_part[None, None]


def combined_loss(inputs, targets, *, gamma=2.0, alpha=None, dice_weight=0.5,
                  smooth=1e-6, hw_tile=16384, logits_dtype=None):
    """CombinedLoss forward: (1 - dice_weight) * focal + dice_weight * dice.

    inputs : (N, C, H, W) logits (f32 or bf16), C == 19.
    targets: (N, H, W) integer labels in [0, 19).
    logits_dtype: optional cast (e.g. jnp.bfloat16) applied at the pallas_call
        boundary to halve the dominant HBM stream; the kernel computes in f32.
    """
    if alpha is not None:
        # TODO(synk): per-class alpha weighting (alpha[targets] * focal) not wired in;
        # the module default is alpha=None.
        raise NotImplementedError("alpha weighting not implemented in the Pallas kernel")

    N, C, H, W = inputs.shape
    assert C == NUM_CLASSES, "module one-hots targets to 19 classes"
    HW = H * W

    x = inputs.reshape(N, C, HW)
    if logits_dtype is not None and x.dtype != logits_dtype:
        x = x.astype(logits_dtype)
    t = targets.reshape(N, 1, HW).astype(jnp.int32)

    # Spatial tile: lane-dense multiple of 128, clamped for small inputs.
    tile = min(int(hw_tile), _round_up(HW, 128))
    tile = _round_up(tile, 128)
    nt = -(-HW // tile)                    # total spatial blocks (last one may over-read)
    ncs = 2 if nt >= 2 else 1              # explicit 2-way core split (v7x megacore)
    nt_half = -(-nt // ncs)                # blocks per core
    needs_mask = (ncs * nt_half != nt) or (nt * tile != HW)

    kernel = functools.partial(
        _combined_loss_kernel,
        gamma=float(gamma), hw=HW, tile=tile, nt=nt, nt_half=nt_half,
        needs_mask=needs_mask,
    )

    cost = pl.CostEstimate(
        flops=int(12 * N * C * HW),
        transcendentals=int(N * C * HW + 2 * N * HW),
        bytes_accessed=int(N * C * HW * x.dtype.itemsize + N * HW * t.dtype.itemsize
                           + N * ncs * (2 * C + 1) * 4),
    )

    idx_in = lambda b, c, s: (b, 0, c * (nt - nt_half) + s)
    inter, union, focal_sum = pl.pallas_call(
        kernel,
        out_shape=(
            jax.ShapeDtypeStruct((N, ncs, C, 1), jnp.float32),   # per-(batch,core,class) intersection
            jax.ShapeDtypeStruct((N, ncs, C, 1), jnp.float32),   # per-(batch,core,class) union
            jax.ShapeDtypeStruct((N, ncs, 1, 1), jnp.float32),   # per-(batch,core) focal sum
        ),
        grid_spec=pltpu.PrefetchScalarGridSpec(
            num_scalar_prefetch=0,
            grid=(N, ncs, nt_half),
            in_specs=[
                pl.BlockSpec((1, C, tile), idx_in),   # logits tile (lane-dense spatial axis)
                pl.BlockSpec((1, 1, tile), idx_in),   # label tile
            ],
            out_specs=[
                pl.BlockSpec((1, 1, C, 1), lambda b, c, s: (b, c, 0, 0)),
                pl.BlockSpec((1, 1, C, 1), lambda b, c, s: (b, c, 0, 0)),
                pl.BlockSpec((1, 1, 1, 1), lambda b, c, s: (b, c, 0, 0)),
            ],
        ),
        compiler_params=pltpu.CompilerParams(
            # batch + core axes parallel (v7x 2-TC split even for N=1), spatial
            # reduction last / arbitrary.
            dimension_semantics=("parallel", "parallel", "arbitrary"),
            vmem_limit_bytes=48 * 1024 * 1024,
        ),
        cost_estimate=cost,
    )(x, t)

    # Tiny final reduction in JAX (keeps the grid fully parallel over batch & cores).
    inter = jnp.sum(inter[:, :, :, 0], axis=1)     # (N, C)
    union = jnp.sum(union[:, :, :, 0], axis=1)     # (N, C)
    dice = (2.0 * inter + smooth) / (union + smooth)
    dice_l = 1.0 - jnp.mean(dice)
    focal_l = jnp.sum(focal_sum) / jnp.float32(N * HW)
    return (1.0 - dice_weight) * focal_l + dice_weight * dice_l


# ----------------------------- pure-JAX reference ---------------------------------
def _combined_loss_ref(inputs, targets, *, gamma=2.0, dice_weight=0.5, smooth=1e-6):
    onehot = jax.nn.one_hot(targets, NUM_CLASSES, dtype=jnp.float32)      # (N,H,W,C)
    onehot = jnp.transpose(onehot, (0, 3, 1, 2))                          # (N,C,H,W)
    # focal
    logp = jax.nn.log_softmax(inputs, axis=1)
    ce = -jnp.sum(logp * onehot, axis=1)                                  # (N,H,W)
    pt = jnp.exp(-ce)
    focal_l = jnp.mean((1.0 - pt) ** gamma * ce)
    # dice
    p = jax.nn.softmax(inputs, axis=1)
    inter = jnp.sum(p * onehot, axis=(2, 3))
    union = jnp.sum(p, axis=(2, 3)) + jnp.sum(onehot, axis=(2, 3))
    dice = (2.0 * inter + smooth) / (union + smooth)
    dice_l = 1.0 - jnp.mean(dice)
    return (1.0 - dice_weight) * focal_l + dice_weight * dice_l


if __name__ == "__main__":
    key = jax.random.PRNGKey(0)
    k1, k2, k3, k4, k5, k6 = jax.random.split(key, 6)

    N, C = 2, NUM_CLASSES

    # Case 1: small, lane-aligned (single spatial tile, no masking, no core split).
    H, W = 16, 16
    logits = jax.random.normal(k1, (N, C, H, W), dtype=jnp.float32)
    labels = jax.random.randint(k2, (N, H, W), 0, NUM_CLASSES, dtype=jnp.int32)
    loss = jax.block_until_ready(combined_loss(logits, labels))
    ref = jax.block_until_ready(_combined_loss_ref(logits, labels))
    assert jnp.allclose(loss, ref, atol=1e-4, rtol=1e-4), (loss, ref)

    # Case 2: non-aligned HW (15x20 = 300) with a forced tiny tile (128) -> 3 spatial
    # blocks: exercises multi-tile accumulation, the ragged-tail mask (no wrapper pad),
    # and the 2-way core split with an odd block count (overlap block masked out).
    H2, W2 = 15, 20
    logits2 = jax.random.normal(k3, (N, C, H2, W2), dtype=jnp.float32)
    labels2 = jax.random.randint(k4, (N, H2, W2), 0, NUM_CLASSES, dtype=jnp.int32)
    loss2 = jax.block_until_ready(combined_loss(logits2, labels2, hw_tile=128))
    ref2 = jax.block_until_ready(_combined_loss_ref(logits2, labels2))
    assert jnp.allclose(loss2, ref2, atol=1e-4, rtol=1e-4), (loss2, ref2)

    # Case 3: bf16 logits at the pallas_call boundary (halves the dominant HBM stream
    # on v5e/v6e); compared against the reference evaluated on the same rounded data.
    logits3 = jax.random.normal(k5, (N, C, H2, W2), dtype=jnp.float32)
    labels3 = jax.random.randint(k6, (N, H2, W2), 0, NUM_CLASSES, dtype=jnp.int32)
    loss3 = jax.block_until_ready(
        combined_loss(logits3, labels3, hw_tile=128, logits_dtype=jnp.bfloat16))
    ref3 = jax.block_until_ready(
        _combined_loss_ref(logits3.astype(jnp.bfloat16).astype(jnp.float32), labels3))
    assert jnp.allclose(loss3, ref3, atol=1e-3, rtol=1e-3), (loss3, ref3)

    print("KERNEL_OK")
</pallas_src>

<mosaic_0001>
module attributes {stable_mosaic.version = 11 : i64} {
  func.func @_combined_loss_kernel(%arg0: i32, %arg1: i32, %arg2: i32, %arg3: memref<1x19x256xf32, #tpu.memory_space<vmem>>, %arg4: memref<1x1x256xi32, #tpu.memory_space<vmem>>, %arg5: memref<1x1x19x1xf32, #tpu.memory_space<vmem>>, %arg6: memref<1x1x19x1xf32, #tpu.memory_space<vmem>>, %arg7: memref<1x1x1x1xf32, #tpu.memory_space<vmem>>) attributes {dimension_semantics = [#tpu.dimension_semantics<parallel>, #tpu.dimension_semantics<parallel>, #tpu.dimension_semantics<arbitrary>], iteration_bounds = array<i64: 2, 1, 1>, scalar_prefetch = 0 : i64, scratch_operands = 0 : i64, tpu.core_type = #tpu.core_type<tc>, window_params = [{transform_indices = @transform_0, window_bounds = array<i64: 1, 19, 256>}, {transform_indices = @transform_1, window_bounds = array<i64: 1, 1, 256>}, {transform_indices = @transform_2, window_bounds = array<i64: 1, 1, 19, 1>}, {transform_indices = @transform_3, window_bounds = array<i64: 1, 1, 19, 1>}, {transform_indices = @transform_4, window_bounds = array<i64: 1, 1, 1, 1>}]} {
    %c0_i32 = arith.constant 0 : i32
    %0 = arith.cmpi eq, %arg2, %c0_i32 : i32
    %1 = arith.extui %0 : i1 to i32
    %c0_i32_0 = arith.constant 0 : i32
    %2 = arith.cmpi ne, %1, %c0_i32_0 : i32
    scf.if %2 {
      %cst_40 = arith.constant 0.000000e+00 : f32
      %58 = vector.broadcast %cst_40 : f32 to vector<1x1x19x1xf32>
      %c0_41 = arith.constant 0 : index
      %c0_42 = arith.constant 0 : index
      %c0_43 = arith.constant 0 : index
      %c0_44 = arith.constant 0 : index
      %59 = vector.load %arg5[%c0_41, %c0_42, %c0_43, %c0_44] : memref<1x1x19x1xf32, #tpu.memory_space<vmem>>, vector<1x1x19x1xf32>
      tpu.vector_store %arg5[%c0_41, %c0_42, %c0_43, %c0_44], %58 {strides = array<i32>} : memref<1x1x19x1xf32, #tpu.memory_space<vmem>>, vector<1x1x19x1xf32>,
      %cst_45 = arith.constant 0.000000e+00 : f32
      %60 = vector.broadcast %cst_45 : f32 to vector<1x1x19x1xf32>
      %c0_46 = arith.constant 0 : index
      %c0_47 = arith.constant 0 : index
      %c0_48 = arith.constant 0 : index
      %c0_49 = arith.constant 0 : index
      %61 = vector.load %arg6[%c0_46, %c0_47, %c0_48, %c0_49] : memref<1x1x19x1xf32, #tpu.memory_space<vmem>>, vector<1x1x19x1xf32>
      tpu.vector_store %arg6[%c0_46, %c0_47, %c0_48, %c0_49], %60 {strides = array<i32>} : memref<1x1x19x1xf32, #tpu.memory_space<vmem>>, vector<1x1x19x1xf32>,
      %cst_50 = arith.constant 0.000000e+00 : f32
      %62 = vector.broadcast %cst_50 : f32 to vector<1x1x1x1xf32>
      %c0_51 = arith.constant 0 : index
      %c0_52 = arith.constant 0 : index
      %c0_53 = arith.constant 0 : index
      %c0_54 = arith.constant 0 : index
      %63 = vector.load %arg7[%c0_51, %c0_52, %c0_53, %c0_54] : memref<1x1x1x1xf32, #tpu.memory_space<vmem>>, vector<1x1x1x1xf32>
      tpu.vector_store %arg7[%c0_51, %c0_52, %c0_53, %c0_54], %62 {strides = array<i32>} : memref<1x1x1x1xf32, #tpu.memory_space<vmem>>, vector<1x1x1x1xf32>,
    } else {
    }
    %c0 = arith.constant 0 : index
    %c0_1 = arith.constant 0 : index
    %c0_2 = arith.constant 0 : index
    %3 = vector.load %arg3[%c0, %c0_1, %c0_2] : memref<1x19x256xf32, #tpu.memory_space<vmem>>, vector<1x19x256xf32>
    %4 = vector.shape_cast %3 : vector<1x19x256xf32> to vector<19x256xf32>
    %c0_3 = arith.constant 0 : index
    %c0_4 = arith.constant 0 : index
    %c0_5 = arith.constant 0 : index
    %5 = vector.load %arg4[%c0_3, %c0_4, %c0_5] : memref<1x1x256xi32, #tpu.memory_space<vmem>>, vector<1x1x256xi32>
    %6 = vector.shape_cast %5 : vector<1x1x256xi32> to vector<1x256xi32>
    %cst = arith.constant dense<0xFF800000> : vector<256xf32>
    %7 = vector.multi_reduction <maximumf>, %4, %cst [0] : vector<19x256xf32> to vector<256xf32>
    %8 = vector.shape_cast %7 : vector<256xf32> to vector<1x256xf32>
    %9 = vector.broadcast %8 : vector<1x256xf32> to vector<19x256xf32>
    %10 = arith.subf %4, %9 : vector<19x256xf32>
    %11 = math.exp %10 : vector<19x256xf32>
    %cst_6 = arith.constant dense<0.000000e+00> : vector<256xf32>
    %12 = vector.multi_reduction <add>, %11, %cst_6 [0] : vector<19x256xf32> to vector<256xf32>
    %13 = vector.shape_cast %12 : vector<256xf32> to vector<1x256xf32>
    %14 = tpu.reciprocal %13 {approx = true} : vector<1x256xf32> -> vector<1x256xf32>
    %15 = arith.mulf %13, %14 : vector<1x256xf32>
    %cst_7 = arith.constant 2.000000e+00 : f32
    %16 = vector.broadcast %cst_7 : f32 to vector<1x256xf32>
    %17 = arith.subf %16, %15 : vector<1x256xf32>
    %18 = arith.mulf %14, %17 : vector<1x256xf32>
    %19 = vector.broadcast %18 : vector<1x256xf32> to vector<19x256xf32>
    %20 = arith.mulf %11, %19 : vector<19x256xf32>
    %21 = tpu.iota {dimensions = array<i32: 0>} : vector<19x256xi32>
    %22 = vector.broadcast %6 : vector<1x256xi32> to vector<19x256xi32>
    %23 = arith.cmpi eq, %21, %22 : vector<19x256xi32>
    %cst_8 = arith.constant 0.000000e+00 : f32
    %24 = vector.broadcast %cst_8 : f32 to vector<19x256xf32>
    %25 = arith.select %23, %20, %24 : vector<19x256xi1>, vector<19x256xf32>
    %26 = arith.extui %23 : vector<19x256xi1> to vector<19x256xi32>
    %27 = arith.sitofp %26 : vector<19x256xi32> to vector<19x256xf32>
    %cst_9 = arith.constant dense<0.000000e+00> : vector<19xf32>
    %28 = vector.multi_reduction <add>, %25, %cst_9 [1] : vector<19x256xf32> to vector<19xf32>
    %29 = vector.shape_cast %28 : vector<19xf32> to vector<19x1xf32>
    %30 = arith.addf %20, %27 : vector<19x256xf32>
    %cst_10 = arith.constant dense<0.000000e+00> : vector<19xf32>
    %31 = vector.multi_reduction <add>, %30, %cst_10 [1] : vector<19x256xf32> to vector<19xf32>
    %32 = vector.shape_cast %31 : vector<19xf32> to vector<19x1xf32>
    %cst_11 = arith.constant dense<0.000000e+00> : vector<256xf32>
    %33 = vector.multi_reduction <add>, %25, %cst_11 [0] : vector<19x256xf32> to vector<256xf32>
    %34 = vector.shape_cast %33 : vector<256xf32> to vector<1x256xf32>
    %cst_12 = arith.constant 1.17549435E-38 : f32
    %35 = vector.broadcast %cst_12 : f32 to vector<1x256xf32>
    %36 = arith.maximumf %34, %35 : vector<1x256xf32>
    %37 = math.log %36 : vector<1x256xf32>
    %cst_13 = arith.constant 0.000000e+00 : f32
    %38 = vector.broadcast %cst_13 : f32 to vector<1x256xf32>
    %39 = arith.subf %38, %37 : vector<1x256xf32>
    %cst_14 = arith.constant 1.000000e+00 : f32
    %40 = vector.broadcast %cst_14 : f32 to vector<1x256xf32>
    %41 = arith.subf %40, %34 : vector<1x256xf32>
    %42 = arith.mulf %41, %41 : vector<1x256xf32>
    %43 = arith.mulf %42, %39 : vector<1x256xf32>
    %cst_15 = arith.constant dense<0.000000e+00> : vector<1xf32>
    %44 = vector.multi_reduction <add>, %43, %cst_15 [1] : vector<1x256xf32> to vector<1xf32>
    %45 = vector.shape_cast %44 : vector<1xf32> to vector<1x1xf32>
    %c0_16 = arith.constant 0 : index
    %c0_17 = arith.constant 0 : index
    %c0_18 = arith.constant 0 : index
    %c0_19 = arith.constant 0 : index
    %46 = vector.load %arg5[%c0_16, %c0_17, %c0_18, %c0_19] : memref<1x1x19x1xf32, #tpu.memory_space<vmem>>, vector<1x1x19x1xf32>
    %47 = vector.shape_cast %29 : vector<19x1xf32> to vector<1x1x19x1xf32>
    %48 = arith.addf %46, %47 : vector<1x1x19x1xf32>
    %c0_20 = arith.constant 0 : index
    %c0_21 = arith.constant 0 : index
    %c0_22 = arith.constant 0 : index
    %c0_23 = arith.constant 0 : index
    %49 = vector.load %arg5[%c0_20, %c0_21, %c0_22, %c0_23] : memref<1x1x19x1xf32, #tpu.memory_space<vmem>>, vector<1x1x19x1xf32>
    tpu.vector_store %arg5[%c0_20, %c0_21, %c0_22, %c0_23], %48 {strides = array<i32>} : memref<1x1x19x1xf32, #tpu.memory_space<vmem>>, vector<1x1x19x1xf32>,
    %c0_24 = arith.constant 0 : index
    %c0_25 = arith.constant 0 : index
    %c0_26 = arith.constant 0 : index
    %c0_27 = arith.constant 0 : index
    %50 = vector.load %arg6[%c0_24, %c0_25, %c0_26, %c0_27] : memref<1x1x19x1xf32, #tpu.memory_space<vmem>>, vector<1x1x19x1xf32>
    %51 = vector.shape_cast %32 : vector<19x1xf32> to vector<1x1x19x1xf32>
    %52 = arith.addf %50, %51 : vector<1x1x19x1xf32>
    %c0_28 = arith.constant 0 : index
    %c0_29 = arith.constant 0 : index
    %c0_30 = arith.constant 0 : index
    %c0_31 = arith.constant 0 : index
    %53 = vector.load %arg6[%c0_28, %c0_29, %c0_30, %c0_31] : memref<1x1x19x1xf32, #tpu.memory_space<vmem>>, vector<1x1x19x1xf32>
    tpu.vector_store %arg6[%c0_28, %c0_29, %c0_30, %c0_31], %52 {strides = array<i32>} : memref<1x1x19x1xf32, #tpu.memory_space<vmem>>, vector<1x1x19x1xf32>,
    %c0_32 = arith.constant 0 : index
    %c0_33 = arith.constant 0 : index
    %c0_34 = arith.constant 0 : index
    %c0_35 = arith.constant 0 : index
    %54 = vector.load %arg7[%c0_32, %c0_33, %c0_34, %c0_35] : memref<1x1x1x1xf32, #tpu.memory_space<vmem>>, vector<1x1x1x1xf32>
    %55 = vector.shape_cast %45 : vector<1x1xf32> to vector<1x1x1x1xf32>
    %56 = arith.addf %54, %55 : vector<1x1x1x1xf32>
    %c0_36 = arith.constant 0 : index
    %c0_37 = arith.constant 0 : index
    %c0_38 = arith.constant 0 : index
    %c0_39 = arith.constant 0 : index
    %57 = vector.load %arg7[%c0_36, %c0_37, %c0_38, %c0_39] : memref<1x1x1x1xf32, #tpu.memory_space<vmem>>, vector<1x1x1x1xf32>
    tpu.vector_store %arg7[%c0_36, %c0_37, %c0_38, %c0_39], %56 {strides = array<i32>} : memref<1x1x1x1xf32, #tpu.memory_space<vmem>>, vector<1x1x1x1xf32>,
    return
  }
  func.func @transform_0(%arg0: i32, %arg1: i32, %arg2: i32) -> (i32, i32, i32) {
    %c0_i32 = arith.constant 0 : i32
    %0 = arith.muli %arg1, %c0_i32 : i32
    %1 = arith.addi %0, %arg2 : i32
    %c0_i32_0 = arith.constant 0 : i32
    %c0_i32_1 = arith.constant 0 : i32
    return %arg0, %c0_i32_0, %1 : i32, i32, i32
  }
  func.func @transform_1(%arg0: i32, %arg1: i32, %arg2: i32) -> (i32, i32, i32) {
    %c0_i32 = arith.constant 0 : i32
    %0 = arith.muli %arg1, %c0_i32 : i32
    %1 = arith.addi %0, %arg2 : i32
    %c0_i32_0 = arith.constant 0 : i32
    %c0_i32_1 = arith.constant 0 : i32
    return %arg0, %c0_i32_0, %1 : i32, i32, i32
  }
  func.func @transform_2(%arg0: i32, %arg1: i32, %arg2: i32) -> (i32, i32, i32, i32) {
    %c0_i32 = arith.constant 0 : i32
    %c0_i32_0 = arith.constant 0 : i32
    %c0_i32_1 = arith.constant 0 : i32
    return %arg0, %arg1, %c0_i32, %c0_i32_0 : i32, i32, i32, i32
  }
  func.func @transform_3(%arg0: i32, %arg1: i32, %arg2: i32) -> (i32, i32, i32, i32) {
    %c0_i32 = arith.constant 0 : i32
    %c0_i32_0 = arith.constant 0 : i32
    %c0_i32_1 = arith.constant 0 : i32
    return %arg0, %arg1, %c0_i32, %c0_i32_0 : i32, i32, i32, i32
  }
  func.func @transform_4(%arg0: i32, %arg1: i32, %arg2: i32) -> (i32, i32, i32, i32) {
    %c0_i32 = arith.constant 0 : i32
    %c0_i32_0 = arith.constant 0 : i32
    %c0_i32_1 = arith.constant 0 : i32
    return %arg0, %arg1, %c0_i32, %c0_i32_0 : i32, i32, i32, i32
  }
}

</mosaic_0001>

<bundles_post_ra>
// kernel: tpu_custom_call.1
= control target key start
LH: loop header
LB: loop body
LE: loop exit
PB: predicated region body
PF: predicated region fallthrough
CT: control target
= control target key end

     0   :  { %s835_s15 = smov 0   ;;  %s837_s16 = smov 0   ;;  %s961_s0 = inlined_call_operand.vmem [shape: f32[2,19,256], index: 0, kind: input, shape index: {}]   ;;  %s962_s1 = inlined_call_operand.vmem [shape: s32[2,1,256], index: 1, kind: input, shape index: {}]   ;;  %s963_s2 = inlined_call_operand.vmem [shape: f32[2,1,19,1], index: 2, kind: output, shape index: {0}]   ;;  %s964_s3 = inlined_call_operand.vmem [shape: f32[2,1,19,1], index: 3, kind: output, shape index: {1}]   ;;  %s965_s4 = inlined_call_operand.vmem [shape: f32[2,1,1,1], index: 4, kind: output, shape index: {2}]  }
   0x1   :  { %s839_s17 = smov 0  }
   0x2 LB: > { %s34_s18 = sadd.s32 1, %s803_s16  ;;  %p725_p0 = scmp.ge.s32.totalorder %s807_s17, 1  ;;  %s807_s17 = sphi %s839_s17, %s15_s17   ;;  %s803_s16 = sphi %s837_s16, %s967_s16   ;;  %s799_s15 = sphi %s835_s15, %s966_s15  }
   0x3   : > { %p36_p1 = scmp.ge.s32.totalorder %s34_s18, 2  ;;  %p215_p2 = scmp.lt.s32.totalorder %s807_s17, 3 }
   0x5   : > { %s969_s18 = smov (%p36_p1, %s34_s18), 0  ;;  %p216_p3 = pnand %p725_p0, %p215_p2 }
   0x6   : > { %p273_p4 = scmp.lt.s32.totalorder (!%p216_p3), %s799_s15, 1  ;;  %vm319_vm0 = vcmask (!%p216_p3), 7168   ;;  %vm336_vm1 = vcmask (!%p216_p3), 1042432   ;;  %v809_v4 = vmov (!%p216_p3), 0.0   ;;  %v405_v59 = vlaneseq (!%p216_p3) }
   0x7   : > { %219 = sbr.rel (%p216_p3) target bundleno = 274 (0x112), region = 28  ;;  %vm322_vm8 = vcmask (!%p216_p3), 2048   ;;  %vm327_vm9 = vcmask (!%p216_p3), 0  }
   0x8   : > { %v406_v62 = vshrl.u32 (!%p216_p3), %v405_v59, 7 }
   0xa   : > { %v411_v63 = vsub.s32 (!%p216_p3), 0, %v406_v62 }
   0xe   : > { %s971_s15 = smov (!%p273_p4, %s799_s15), 1 }
   0xf   : > { %s738_s19 = smul.u32 48, %s971_s15  ;;  %s727_s27 = sshll.u32 %s971_s15, 1 }
  0x10   : > { %s739_s20 = smul.u32 24, %s971_s15  ;;  %s289_s30 = scalar_lea.vmem %s962_s1, %s727_s27 }
  0x11   : > { %s280_s23 = scalar_lea.vmem %s961_s0, %s738_s19  ;;  %s926_s10 = scalar_lea.vmem %s965_s4, %s971_s15 }
  0x12   : > { %v329_v0 = vld [vmem:[%s280_s23] sm:$0xff]  ;;  %v330_v1 = vld [vmem:[%s280_s23 + $0x8] sm:$0xff]  ;;  %s865_s26 = scalar_lea.vmem %s963_s2, %s739_s20  ;;  %v331_v5 = vld [vmem:[%s280_s23 + $0x10] sm:$0xff]  ;;  %s911_s7 = scalar_lea.vmem %s964_s3, %s739_s20  ;;  %328 = vst.msk [vmem:[%s926_s10] sm:$0x1] %vm327_vm9, %v809_v4 }
  0x13   : > { %v333_v2 = vld [vmem:[%s280_s23 + $0x20] sm:$0x7]  ;;  %v334_v3 = vld [vmem:[%s280_s23 + $0x28] sm:$0x7]  ;;  %320 = vst.msk [vmem:[%s865_s26] sm:$0xff] %vm319_vm0, %v809_v4  ;;  %321 = vst.msk [vmem:[%s865_s26 + $0x8] sm:$0xff] %vm319_vm0, %v809_v4 }
  0x14   : > { %v332_v6 = vld [vmem:[%s280_s23 + $0x18] sm:$0xff]  ;;  %v337_v7 = vsel %vm336_vm1, %v333_v2, -inf  ;;  %v346_v8 = vsel %vm336_vm1, %v334_v3, -inf  ;;  %323 = vst.msk [vmem:[%s865_s26 + $0x10] sm:$0x7] %vm322_vm8, %v809_v4 }
  0x15   : > { %v338_v9 = vmax.f32 %v329_v0, %v337_v7  ;;  %v347_v10 = vmax.f32 %v330_v1, %v346_v8  ;;  %324 = vst.msk [vmem:[%s911_s7] sm:$0xff] %vm319_vm0, %v809_v4  ;;  %325 = vst.msk [vmem:[%s911_s7 + $0x8] sm:$0xff] %vm319_vm0, %v809_v4 }
  0x16   : > { %326 = vst.msk [vmem:[%s911_s7 + $0x10] sm:$0x7] %vm322_vm8, %v809_v4 }
  0x17   : > { %v339_v11 = vmax.f32 %v338_v9, %v331_v5  ;;  %v348_v12 = vmax.f32 %v347_v10, %v332_v6  ;;  %v408_v9 = vadd.s32 16, %v406_v62 }
  0x19   : > { %v340_v13 = vrot.slane %v339_v11, 4  ;;  %v349_v14 = vrot.slane %v348_v12, 4 }
  0x1b   : > { %v341_v15 = vmax.f32 %v339_v11, %v340_v13  ;;  %v350_v16 = vmax.f32 %v348_v12, %v349_v14 }
  0x1d   : > { %v342_v17 = vrot.slane %v341_v15, 2  ;;  %v351_v18 = vrot.slane %v350_v16, 2 }
  0x1f   : > { %v343_v19 = vmax.f32 %v341_v15, %v342_v17  ;;  %v352_v20 = vmax.f32 %v350_v16, %v351_v18 }
  0x21   : > { %v344_v21 = vrot.slane %v343_v19, 1  ;;  %v353_v22 = vrot.slane %v352_v20, 1 }
  0x23   : > { %v345_v23 = vmax.f32 %v343_v19, %v344_v21  ;;  %v354_v24 = vmax.f32 %v352_v20, %v353_v22 }
  0x25   : > { %v355_v25 = vsub.f32 %v329_v0, %v345_v23  ;;  %v356_v26 = vsub.f32 %v330_v1, %v354_v24  ;;  %v357_v27 = vsub.f32 %v331_v5, %v345_v23  ;;  %v358_v28 = vsub.f32 %v332_v6, %v354_v24  ;;  %v335_v0 = vld [vmem:[%s289_s30] sm:$0x3] }
  0x26   : > { %v359_v29 = vsub.f32 %v333_v2, %v345_v23  ;;  %v360_v30 = vsub.f32 %v334_v3, %v354_v24  ;;  %v415_v1 = vsub.s32 1, %v406_v62  ;;  %v412_v2 = vrot.slane %v335_v0, %v411_v63 }
  0x27   : > { %v361_v31 = vmul.f32 1.442695, %v355_v25  ;;  %v363_v32 = vmul.f32 1.442695, %v356_v26  ;;  %v365_v33 = vmul.f32 1.442695, %v357_v27 }
  0x28   : > { %v367_v34 = vmul.f32 1.442695, %v358_v28  ;;  %v369_v35 = vmul.f32 1.442695, %v359_v29  ;;  %v371_v36 = vmul.f32 1.442695, %v360_v30  ;;  %v416_v6 = vrot.slane %v335_v0, %v415_v1 }
  0x29   : > { %765 = vpow2.f32 %v361_v31  ;;  %v407_v5 = vadd.s32 8, %v406_v62  ;;  %vm417_vm2 = vcmp.eq.s32.totalorder %v406_v62, %v412_v2  ;;  %vm421_vm6 = vcmp.eq.s32.totalorder %v408_v9, %v412_v2 }
  0x2a   : > { %767 = vpow2.f32 %v363_v32  ;;  %vm418_vm3 = vcmp.eq.s32.totalorder %v406_v62, %v416_v6  ;;  %v730_v14 = vsel %vm417_vm2, 1.0, %v809_v4  ;;  %vm422_vm7 = vcmp.eq.s32.totalorder %v408_v9, %v416_v6 }
  0x2b   : > { %769 = vpow2.f32 %v365_v33  ;;  %vm419_vm4 = vcmp.eq.s32.totalorder %v407_v5, %v412_v2  ;;  %vm420_vm5 = vcmp.eq.s32.totalorder %v407_v5, %v416_v6  ;;  %v731_v16 = vsel %vm418_vm3, 1.0, %v809_v4 }
  0x2c   : > { %771 = vpow2.f32 %v367_v34  ;;  %v734_v17 = vsel %vm421_vm6, 1.0, %v809_v4  ;;  %v735_v18 = vsel %vm422_vm7, 1.0, %v809_v4  ;;  %v732_v22 = vsel %vm419_vm4, 1.0, %v809_v4 }
  0x2d   : > { %773 = vpow2.f32 %v369_v35  ;;  %v733_v26 = vsel %vm420_vm5, 1.0, %v809_v4 }
  0x2e   : > { %775 = vpow2.f32 %v371_v36 }
  0x33   : > { %v766_v37 = vpop.eup %765 }
  0x34   : > { %v768_v38 = vpop.eup %767 }
  0x35   : > { %v770_v39 = vpop.eup %769 }
  0x36   : > { %v772_v40 = vpop.eup %771  ;;  %v373_v41 = vadd.f32 %v770_v39, %v766_v37 }
  0x37   : > { %v774_v42 = vpop.eup %773  ;;  %v382_v43 = vadd.f32 %v772_v40, %v768_v38 }
  0x38   : > { %v776_v44 = vpop.eup %775  ;;  %v374_v45 = vsel %vm336_vm1, %v774_v42, 0.0 }
  0x39   : > { %v375_v46 = vadd.f32 %v374_v45, %v373_v41  ;;  %v383_v47 = vsel %vm336_vm1, %v776_v44, 0.0 }
  0x3a   : > { %v384_v48 = vadd.f32 %v383_v47, %v382_v43 }
  0x3b   : > { %v376_v49 = vrot.slane %v375_v46, 4 }
  0x3c   : > { %v385_v50 = vrot.slane %v384_v48, 4 }
  0x3d   : > { %v377_v51 = vadd.f32 %v376_v49, %v375_v46 }
  0x3e   : > { %v386_v52 = vadd.f32 %v385_v50, %v384_v48 }
  0x3f   : > { %v378_v53 = vrot.slane %v377_v51, 2 }
  0x40   : > { %v387_v54 = vrot.slane %v386_v52, 2 }
  0x41   : > { %v379_v55 = vadd.f32 %v378_v53, %v377_v51 }
  0x42   : > { %v388_v56 = vadd.f32 %v387_v54, %v386_v52 }
  0x43   : > { %v380_v57 = vrot.slane %v379_v55, 1 }
  0x44   : > { %v389_v58 = vrot.slane %v388_v56, 1 }
  0x45   : > { %v381_v60 = vadd.f32 %v380_v57, %v379_v55 }
  0x46   : > { %v390_v61 = vadd.f32 %v389_v58, %v388_v56 }
  0x47   : > { %777 = vrcp.f32 %v381_v60 }
  0x48   : > { %779 = vrcp.f32 %v390_v61 }
  0x51   : > { %v778_v3 = vpop.eup %777 }
  0x52   : > { %v780_v7 = vpop.eup %779  ;;  %v393_v8 = vmul.f32 %v778_v3, %v381_v60 }
  0x53   : > { %v394_v10 = vmul.f32 %v780_v7, %v390_v61 }
  0x54   : > { %v395_v11 = vsub.f32 2.0, %v393_v8 }
  0x55   : > { %v396_v12 = vsub.f32 2.0, %v394_v10 }
  0x56   : > { %v397_v13 = vmul.f32 %v778_v3, %v395_v11 }
  0x57   : > { %v398_v15 = vmul.f32 %v780_v7, %v396_v12 }
  0x58   : > { %v399_v19 = vmul.f32 %v766_v37, %v397_v13  ;;  %v401_v20 = vmul.f32 %v770_v39, %v397_v13  ;;  %v403_v21 = vmul.f32 %v774_v42, %v397_v13 }
  0x59   : > { %v400_v23 = vmul.f32 %v768_v38, %v398_v15  ;;  %v402_v24 = vmul.f32 %v772_v40, %v398_v15  ;;  %v404_v25 = vmul.f32 %v776_v44, %v398_v15 }
  0x5a   : > { %v423_v27 = vsel %vm417_vm2, %v399_v19, 0.0  ;;  %v425_v28 = vsel %vm419_vm4, %v401_v20, 0.0  ;;  %v427_v29 = vsel %vm421_vm6, %v403_v21, 0.0  ;;  %v452_v30 = vadd.f32 %v730_v14, %v399_v19 }
  0x5b   : > { %v424_v31 = vsel %vm418_vm3, %v400_v23, 0.0  ;;  %v426_v32 = vsel %vm420_vm5, %v402_v24, 0.0  ;;  %v469_v33 = vadd.f32 %v425_v28, %v423_v27  ;;  %v428_v34 = vsel %vm422_vm7, %v404_v25, 0.0 }
  0x5c   : > { %v441_v35 = vadd.f32 %v424_v31, %v423_v27  ;;  %v477_v36 = vadd.f32 %v426_v32, %v424_v31  ;;  %v447_v37 = vsel %vm336_vm1, %v427_v29, 0.0  ;;  %v448_v38 = vsel %vm336_vm1, %v428_v34, 0.0  ;;  %v515_v29 = vld [vmem:[%s911_s7 + $0x10] sm:$0x7]  ;;  %v522_v34 = vld [vmem:[%s926_s10] sm:$0x1] }
  0x5d   : > { %v449_v39 = vadd.f32 %v448_v38, %v447_v37  ;;  %v470_v40 = vadd.f32 %v469_v33, %v447_v37  ;;  %v444_v41 = vadd.f32 %v426_v32, %v425_v28  ;;  %v453_v42 = vadd.f32 %v731_v16, %v400_v23  ;;  %v513_v23 = vld [vmem:[%s911_s7] sm:$0xff]  ;;  %v514_v28 = vld [vmem:[%s911_s7 + $0x8] sm:$0xff] }
  0x5e   : > { %442 = vadd.xlane.f32.xlu0 %v441_v35  ;;  %v478_v43 = vadd.f32 %v477_v36, %v448_v38  ;;  %v454_v44 = vadd.f32 %v732_v22, %v401_v20  ;;  %v455_v45 = vadd.f32 %v733_v26, %v402_v24  ;;  %v456_v46 = vadd.f32 %v734_v17, %v403_v21  ;;  %v502_v17 = vld [vmem:[%s865_s26] sm:$0xff]  ;;  %v503_v22 = vld [vmem:[%s865_s26 + $0x8] sm:$0xff] }
  0x5f   : > { %450 = vadd.xlane.f32.xlu1 %v449_v39  ;;  %v471_v47 = vrot.slane %v470_v40, 4  ;;  %v458_v48 = vadd.f32 %v453_v42, %v452_v30  ;;  %v457_v49 = vadd.f32 %v735_v18, %v404_v25  ;;  %v504_v18 = vld [vmem:[%s865_s26 + $0x10] sm:$0x7] }
  0x60   : > { %v479_v50 = vrot.slane %v478_v43, 4  ;;  %v464_v51 = vsel %vm336_vm1, %v456_v46, 0.0  ;;  %v461_v55 = vadd.f32 %v455_v45, %v454_v44 }
  0x61   : > { %v472_v52 = vadd.f32 %v471_v47, %v470_v40  ;;  %v465_v53 = vsel %vm336_vm1, %v457_v49, 0.0 }
  0x62   : > { %v480_v54 = vadd.f32 %v479_v50, %v478_v43  ;;  %445 = vadd.xlane.f32.xlu0 %v444_v41  ;;  %v466_v57 = vadd.f32 %v465_v53, %v464_v51 }
  0x63   : > { %v473_v56 = vrot.slane %v472_v52, 2  ;;  %459 = vadd.xlane.f32.xlu1 %v458_v48 }
  0x64   : > { %v481_v58 = vrot.slane %v480_v54, 2 }
  0x65   : > { %v474_v59 = vadd.f32 %v473_v56, %v472_v52 }
  0x66   : > { %v482_v60 = vadd.f32 %v481_v58, %v480_v54  ;;  %462 = vadd.xlane.f32.xlu0 %v461_v55 }
  0x67   : > { %v475_v61 = vrot.slane %v474_v59, 1  ;;  %467 = vadd.xlane.f32.xlu1 %v466_v57 }
  0x68   : > { %v483_v62 = vrot.slane %v482_v60, 1 }
  0x69   : > { %v476_v63 = vadd.f32 %v475_v61, %v474_v59 }
  0x6a   : > { %v484_v0 = vadd.f32 %v483_v62, %v482_v60 }
  0x6b   : > { %v485_v1 = vmax.f32 %v476_v63, 1.1754944e-38  ;;  %v493_v3 = vsub.f32 1.0, %v476_v63 }
  0x6c   : > { %v486_v2 = vmax.f32 %v484_v0, 1.1754944e-38  ;;  %v494_v5 = vsub.f32 1.0, %v484_v0 }
  0x6d   : > { %781 = vlog2.f32 %v485_v1  ;;  %v495_v9 = vmul.f32 %v493_v3, %v493_v3 }
  0x6e   : > { %783 = vlog2.f32 %v486_v2  ;;  %v496_v11 = vmul.f32 %v494_v5, %v494_v5 }
  0x77   : > { %v782_v6 = vpop.eup %781 }
  0x78   : > { %v784_v7 = vpop.eup %783  ;;  %v488_v8 = vmul.f32 0.6931472, %v782_v6 }
  0x79   : > { %v490_v10 = vmul.f32 0.6931472, %v784_v7 }
  0x7a   : > { %v491_v12 = vsub.f32 0.0, %v488_v8 }
  0x7b   : > { %v492_v13 = vsub.f32 0.0, %v490_v10 }
  0x7c   : > { %v497_v14 = vmul.f32 %v495_v9, %v491_v12 }
  0x7d   : > { %v498_v15 = vmul.f32 %v496_v11, %v492_v13 }
  0x7f   : > { %v499_v16 = vadd.f32 %v498_v15, %v497_v14 }
  0x81   : > { %500 = vadd.xlane.f32.xlu0 %v499_v16 }
  0xeb   : > { %v443_v19 = vpop.xlane.xlu0 %442 }
  0xec   : > { %v505_v20 = vadd.f32 %v502_v17, %v443_v19  ;;  %v451_v4 = vpop.xlane.xlu1 %450 }
  0xed   : > { %v507_v21 = vadd.f32 %v504_v18, %v451_v4 }
  0xee   : > { %509 = vst.msk [vmem:[%s865_s26] sm:$0xff] %vm319_vm0, %v505_v20 }
  0xef   : > { %512 = vst.msk [vmem:[%s865_s26 + $0x10] sm:$0x7] %vm322_vm8, %v507_v21  ;;  %v446_v24 = vpop.xlane.xlu0 %445 }
  0xf0   : > { %v506_v25 = vadd.f32 %v503_v22, %v446_v24  ;;  %v460_v26 = vpop.xlane.xlu1 %459 }
  0xf1   : > { %v516_v27 = vadd.f32 %v513_v23, %v460_v26 }
  0xf2   : > { %510 = vst.msk [vmem:[%s865_s26 + $0x8] sm:$0xff] %vm319_vm0, %v506_v25 }
  0xf3   : > { %519 = vst.msk [vmem:[%s911_s7] sm:$0xff] %vm319_vm0, %v516_v27  ;;  %v463_v30 = vpop.xlane.xlu0 %462 }
  0xf4   : > { %v517_v31 = vadd.f32 %v514_v28, %v463_v30  ;;  %v468_v32 = vpop.xlane.xlu1 %467 }
  0xf5   : > { %v518_v33 = vadd.f32 %v515_v29, %v468_v32 }
  0xf6   : > { %520 = vst.msk [vmem:[%s911_s7 + $0x8] sm:$0xff] %vm319_vm0, %v517_v31 }
  0xf7   : > { %521 = vst.msk [vmem:[%s911_s7 + $0x10] sm:$0x7] %vm322_vm8, %v518_v33 }
 0x10e   : > { %v501_v35 = vpop.xlane.xlu0 %500 }
 0x10f   : > { %v523_v36 = vadd.f32 %v522_v34, %v501_v35 }
 0x111   : > { %525 = vst.msk [vmem:[%s926_s10] sm:$0x1] %vm327_vm9, %v523_v36 }
 0x112 PF: > { %s15_s17 = sadd.s32 1, %s807_s17   ;;  %s966_s15 = smov %s803_s16 }
 0x113   : > { %p12_p5 = scmp.ge.s32.totalorder %s15_s17, 4   ;;  %s967_s16 = smov %s969_s18 }
 0x115   :  { %14 = sbr.rel (!%p12_p5) target bundleno = 2 (0x2), region = 89 }

</bundles_post_ra>
